<compile_context>
chip_gen: v7x
topology: tpu7x:2x2x1
jax: 0.10.0
libtpu: 0.0.40
codegen_flags: <defaults>
</compile_context>

<pallas_src>
import math
import functools

import jax
import jax.numpy as jnp
from jax.experimental import pallas as pl
from jax.experimental.pallas import tpu as pltpu


# ----------------------------------------------------------------------------
# Fused MHA kernel: one (batch, query-tile) per grid step, all heads per step.
# ----------------------------------------------------------------------------
def _mha_kernel(q_ref, k_ref, v_ref, bias_ref, w_ref, b_ref,
                out_ref, attn_ref, kv_ref, *, h):
    tq = q_ref.shape[1]
    S = k_ref.shape[1]
    D = k_ref.shape[2]
    d_k = D // h

    # ---- K / V projections: full-D matmuls, once per batch element ---------
    @pl.when(pl.program_id(1) == 0)
    def _():
        xk = k_ref[0].astype(jnp.bfloat16)
        xv = v_ref[0].astype(jnp.bfloat16)
        kv_ref[0] = (jnp.dot(xk, w_ref[1].astype(jnp.bfloat16),
                             preferred_element_type=jnp.float32)
                     + b_ref[1]).astype(kv_ref.dtype)
        kv_ref[1] = (jnp.dot(xv, w_ref[2].astype(jnp.bfloat16),
                             preferred_element_type=jnp.float32)
                     + b_ref[2]).astype(kv_ref.dtype)

    # ---- Q projection for this tile (1/sqrt(d_k) folded into w_ref[0]) -----
    q_all = (jnp.dot(q_ref[0].astype(jnp.bfloat16),
                     w_ref[0].astype(jnp.bfloat16),
                     preferred_element_type=jnp.float32) + b_ref[0])   # (tq, D) f32
    q_bf = q_all.astype(jnp.bfloat16)      # MXU operand, cast once
    k_bf = kv_ref[0]                       # (S, D) bf16, cached
    v_bf = kv_ref[1]                       # (S, D) bf16, cached

    # Hoisted broadcast of the additive key-padding bias (0 / -1e15).
    bias = jnp.broadcast_to(bias_ref[0], (tq, S)).astype(jnp.float32)

    attn_sum = jnp.zeros((tq, S), dtype=jnp.float32)
    x_heads = []
    # Static unroll over heads (h is small here).
    # TODO(synk): move heads onto a grid axis for h >= 16 to bound live ranges.
    for hh in range(h):
        sl = slice(hh * d_k, (hh + 1) * d_k)
        # scores = q_h @ k_h^T  (contract d_k directly; no transposed copy)
        s = jax.lax.dot_general(q_bf[:, sl], k_bf[:, sl],
                                (((1,), (1,)), ((), ())),
                                preferred_element_type=jnp.float32)
        s = s + bias                                   # masked positions ~ -1e15
        s = s - jnp.max(s, axis=-1, keepdims=True)     # stable softmax (f32)
        e = jnp.exp(s)
        p = e / jnp.sum(e, axis=-1, keepdims=True)     # exact normalization
        attn_sum = attn_sum + p
        x_heads.append(jnp.dot(p.astype(jnp.bfloat16), v_bf[:, sl],
                               preferred_element_type=jnp.float32))   # (tq, d_k)

    # Lane-dense head merge + single full-D output projection.
    x_merged = jnp.concatenate(x_heads, axis=-1)                       # (tq, D)
    out = (jnp.dot(x_merged.astype(jnp.bfloat16),
                   w_ref[3].astype(jnp.bfloat16),
                   preferred_element_type=jnp.float32) + b_ref[3])

    out_ref[0] = out.astype(out_ref.dtype)
    attn_ref[0] = (attn_sum * (1.0 / h)).astype(attn_ref.dtype)


def _pick_query_tile(S):
    """Largest q-tile <= 256 that satisfies the (8,128) block constraint."""
    if S <= 256:
        return S
    for t in range(256, 7, -8):
        if S % t == 0:
            return t
    return S


def _vmem_bytes_estimate(S, D, tq):
    f32, bf16, db = 4, 2, 2   # db = default double-buffering
    blocks = db * (tq * D        # query tile
                   + 2 * S * D   # key + value blocks
                   + S           # mask bias
                   + tq * D      # output tile
                   + tq * S) * f32  # attention tile
    weights = db * (4 * D * D + 4 * D) * f32
    scratch = 2 * S * D * bf16   # cached K/V projections
    return blocks + weights + scratch


def mha_pallas(query, key, value, mask_bias, w_all, b_all, h):
    B, S, D = query.shape
    tq = _pick_query_tile(S)
    n_qt = S // tq

    vmem_limit = min(max(2 * _vmem_bytes_estimate(S, D, tq), 32 << 20), 64 << 20)

    return pl.pallas_call(
        functools.partial(_mha_kernel, h=h),
        out_shape=(
            jax.ShapeDtypeStruct((B, S, D), jnp.float32),
            jax.ShapeDtypeStruct((B, S, S), jnp.float32),
        ),
        grid_spec=pltpu.PrefetchScalarGridSpec(
            num_scalar_prefetch=0,
            grid=(B, n_qt),
            in_specs=[
                pl.BlockSpec((1, tq, D), lambda b, q: (b, q, 0)),   # query tile
                pl.BlockSpec((1, S, D), lambda b, q: (b, 0, 0)),    # key   (resident per b)
                pl.BlockSpec((1, S, D), lambda b, q: (b, 0, 0)),    # value (resident per b)
                pl.BlockSpec((1, 1, S), lambda b, q: (b, 0, 0)),    # additive mask bias
                pl.BlockSpec(w_all.shape, lambda b, q: (0, 0, 0)),  # (4,D,D) weights, resident
                pl.BlockSpec(b_all.shape, lambda b, q: (0, 0, 0)),  # (4,1,D) biases,  resident
            ],
            out_specs=[
                pl.BlockSpec((1, tq, D), lambda b, q: (b, q, 0)),   # merged-head output
                pl.BlockSpec((1, tq, S), lambda b, q: (b, q, 0)),   # head-mean attention
            ],
            scratch_shapes=[pltpu.VMEM((2, S, D), jnp.bfloat16)],   # cached K/V projections
        ),
        compiler_params=pltpu.CompilerParams(
            dimension_semantics=("parallel", "arbitrary"),
            vmem_limit_bytes=int(vmem_limit)),
    )(query, key, value, mask_bias, w_all, b_all)


# ----------------------------------------------------------------------------
# Parameters & forward wrapper
# ----------------------------------------------------------------------------
def init_params(rng, d_model):
    # 4 Linear(d_model, d_model) layers; PyTorch-like uniform init with bound
    # 1/sqrt(fan_in). Weights stored pre-transposed as (D_in, D_out).
    params = {}
    bound = 1.0 / math.sqrt(d_model)
    keys = jax.random.split(rng, 8)
    for i in range(4):
        params[f"w{i}"] = jax.random.uniform(
            keys[2 * i], (d_model, d_model), minval=-bound, maxval=bound,
            dtype=jnp.float32)
        params[f"b{i}"] = jax.random.uniform(
            keys[2 * i + 1], (1, d_model), minval=-bound, maxval=bound,
            dtype=jnp.float32)
    return params


def multi_headed_attention(params, query, key, value, mask, h):
    # Projection order matches the PyTorch module:
    #   linears[0]->key, linears[1]->value, linears[2]->query, linears[3]->out
    B, S, D = query.shape
    d_k = D // h
    scale = jnp.float32(1.0 / math.sqrt(d_k))

    # Stack full-D weight slabs [q, k, v, out]; 1/sqrt(d_k) folded into q.
    w_all = jnp.stack([params["w2"] * scale, params["w0"],
                       params["w1"], params["w3"]])                # (4, D, D)
    b_all = jnp.stack([params["b2"] * scale, params["b0"],
                       params["b1"], params["b3"]])                # (4, 1, D)

    # Key-padding mask (B,1,S) -> additive f32 bias; broadcast over heads and
    # query positions reproduces mask.unsqueeze(1) in the PyTorch forward.
    if mask is None:
        mask_bias = jnp.zeros((B, 1, S), dtype=jnp.float32)
    else:
        mask_bias = jnp.where(mask == 0, jnp.float32(-1e15), jnp.float32(0.0))

    out, attn_mean = mha_pallas(query, key, value, mask_bias, w_all, b_all, h)
    return out, attn_mean


# ----------------------------------------------------------------------------
# Pure-JAX reference for a sanity check.
# ----------------------------------------------------------------------------
def reference(params, query, key, value, mask, h):
    B, S, D = query.shape
    d_k = D // h
    lin = lambda x, w, b: x @ w + b
    k_p = lin(key, params["w0"], params["b0"])
    v_p = lin(value, params["w1"], params["b1"])
    q_p = lin(query, params["w2"], params["b2"])
    sh = lambda x: x.reshape(B, S, h, d_k).transpose(0, 2, 1, 3)
    q4, k4, v4 = sh(q_p), sh(k_p), sh(v_p)
    scores = jnp.einsum("bhqd,bhkd->bhqk", q4, k4) / math.sqrt(d_k)
    m = mask[:, None, :, :]                                       # (B,1,1,S)
    scores = jnp.where(m == 0, -1e15, scores)
    p = jax.nn.softmax(scores, axis=-1)
    x = jnp.einsum("bhqk,bhkd->bhqd", p, v4)
    x = x.transpose(0, 2, 1, 3).reshape(B, S, D)
    out = lin(x, params["w3"], params["b3"])
    return out, jnp.mean(p, axis=1)


if __name__ == "__main__":
    B, S, D, H = 2, 8, 32, 4

    root = jax.random.PRNGKey(0)
    kp, kq, kk, kv = jax.random.split(root, 4)
    params = init_params(kp, D)

    query = jax.random.normal(kq, (B, S, D), dtype=jnp.float32)
    key = jax.random.normal(kk, (B, S, D), dtype=jnp.float32)
    value = jax.random.normal(kv, (B, S, D), dtype=jnp.float32)
    # key-padding mask: last 2 positions of batch 1 are masked out
    mask = jnp.ones((B, 1, S), dtype=jnp.int32)
    mask = mask.at[1, 0, -2:].set(0)

    fwd = jax.jit(functools.partial(multi_headed_attention, h=H))
    out, attn_mean = fwd(params, query, key, value, mask)
    jax.block_until_ready((out, attn_mean))

    ref_out, ref_attn = reference(params, query, key, value, mask, H)
    assert out.shape == (B, S, D) and attn_mean.shape == (B, S, S)
    # Tolerances account for bf16 MXU operands (matmuls); softmax and all
    # accumulation are f32 with an exact normalizer.
    assert jnp.allclose(out, ref_out, atol=5e-2, rtol=5e-2), \
        float(jnp.max(jnp.abs(out - ref_out)))
    assert jnp.allclose(attn_mean, ref_attn, atol=2e-2, rtol=2e-2), \
        float(jnp.max(jnp.abs(attn_mean - ref_attn)))

    print("KERNEL_OK")
</pallas_src>

<mosaic_0001>
module attributes {stable_mosaic.version = 11 : i64} {
  func.func @_mha_kernel(%arg0: i32, %arg1: i32, %arg2: memref<1x8x32xf32, #tpu.memory_space<vmem>>, %arg3: memref<1x8x32xf32, #tpu.memory_space<vmem>>, %arg4: memref<1x8x32xf32, #tpu.memory_space<vmem>>, %arg5: memref<1x1x8xf32, #tpu.memory_space<vmem>>, %arg6: memref<4x32x32xf32, #tpu.memory_space<vmem>>, %arg7: memref<4x1x32xf32, #tpu.memory_space<vmem>>, %arg8: memref<1x8x32xf32, #tpu.memory_space<vmem>>, %arg9: memref<1x8x8xf32, #tpu.memory_space<vmem>>, %arg10: memref<2x8x32xbf16, #tpu.memory_space<vmem>>) attributes {dimension_semantics = [#tpu.dimension_semantics<parallel>, #tpu.dimension_semantics<arbitrary>], iteration_bounds = array<i64: 2, 1>, scalar_prefetch = 0 : i64, scratch_operands = 1 : i64, tpu.core_type = #tpu.core_type<tc>, window_params = [{transform_indices = @transform_0, window_bounds = array<i64: 1, 8, 32>}, {transform_indices = @transform_1, window_bounds = array<i64: 1, 8, 32>}, {transform_indices = @transform_2, window_bounds = array<i64: 1, 8, 32>}, {transform_indices = @transform_3, window_bounds = array<i64: 1, 1, 8>}, {pipeline_mode = #tpu.pipeline_mode<synchronous>, transform_indices = @transform_4, window_bounds = array<i64: 4, 32, 32>}, {pipeline_mode = #tpu.pipeline_mode<synchronous>, transform_indices = @transform_5, window_bounds = array<i64: 4, 1, 32>}, {transform_indices = @transform_6, window_bounds = array<i64: 1, 8, 32>}, {transform_indices = @transform_7, window_bounds = array<i64: 1, 8, 8>}]} {
    %c0_i32 = arith.constant 0 : i32
    %0 = arith.cmpi eq, %arg1, %c0_i32 : i32
    %1 = arith.extui %0 : i1 to i32
    %c0_i32_0 = arith.constant 0 : i32
    %2 = arith.cmpi ne, %1, %c0_i32_0 : i32
    scf.if %2 {
      %c0_47 = arith.constant 0 : index
      %c0_48 = arith.constant 0 : index
      %c0_49 = arith.constant 0 : index
      %110 = vector.load %arg3[%c0_47, %c0_48, %c0_49] : memref<1x8x32xf32, #tpu.memory_space<vmem>>, vector<1x8x32xf32>
      %111 = vector.shape_cast %110 : vector<1x8x32xf32> to vector<8x32xf32>
      %112 = arith.truncf %111 : vector<8x32xf32> to vector<8x32xbf16>
      %c0_50 = arith.constant 0 : index
      %c0_51 = arith.constant 0 : index
      %c0_52 = arith.constant 0 : index
      %113 = vector.load %arg4[%c0_50, %c0_51, %c0_52] : memref<1x8x32xf32, #tpu.memory_space<vmem>>, vector<1x8x32xf32>
      %114 = vector.shape_cast %113 : vector<1x8x32xf32> to vector<8x32xf32>
      %115 = arith.truncf %114 : vector<8x32xf32> to vector<8x32xbf16>
      %c1_53 = arith.constant 1 : index
      %c0_54 = arith.constant 0 : index
      %c0_55 = arith.constant 0 : index
      %116 = vector.load %arg6[%c1_53, %c0_54, %c0_55] : memref<4x32x32xf32, #tpu.memory_space<vmem>>, vector<1x32x32xf32>
      %117 = vector.shape_cast %116 : vector<1x32x32xf32> to vector<32x32xf32>
      %118 = arith.truncf %117 : vector<32x32xf32> to vector<32x32xbf16>
      %cst_56 = arith.constant dense<0.000000e+00> : vector<8x32xf32>
      %119 = tpu.matmul %112, %118, %cst_56 {dimension_numbers = #tpu.dot_dimension_numbers<[1], [0], [0], [1], [0, 0, 1, 1], [], []>} : vector<8x32xbf16>, vector<32x32xbf16>, vector<8x32xf32> -> vector<8x32xf32>
      %c1_57 = arith.constant 1 : index
      %c0_58 = arith.constant 0 : index
      %c0_59 = arith.constant 0 : index
      %120 = vector.load %arg7[%c1_57, %c0_58, %c0_59] : memref<4x1x32xf32, #tpu.memory_space<vmem>>, vector<1x1x32xf32>
      %121 = vector.shape_cast %120 : vector<1x1x32xf32> to vector<1x32xf32>
      %122 = vector.broadcast %121 : vector<1x32xf32> to vector<8x32xf32>
      %123 = arith.addf %119, %122 : vector<8x32xf32>
      %124 = arith.truncf %123 : vector<8x32xf32> to vector<8x32xbf16>
      %c0_60 = arith.constant 0 : index
      %c0_61 = arith.constant 0 : index
      %c0_62 = arith.constant 0 : index
      %125 = vector.load %arg10[%c0_60, %c0_61, %c0_62] : memref<2x8x32xbf16, #tpu.memory_space<vmem>>, vector<1x8x32xbf16>
      %126 = vector.shape_cast %125 : vector<1x8x32xbf16> to vector<8x32xbf16>
      %127 = vector.shape_cast %124 : vector<8x32xbf16> to vector<1x8x32xbf16>
      tpu.vector_store %arg10[%c0_60, %c0_61, %c0_62], %127 {strides = array<i32>} : memref<2x8x32xbf16, #tpu.memory_space<vmem>>, vector<1x8x32xbf16>,
      %c2 = arith.constant 2 : index
      %c0_63 = arith.constant 0 : index
      %c0_64 = arith.constant 0 : index
      %128 = vector.load %arg6[%c2, %c0_63, %c0_64] : memref<4x32x32xf32, #tpu.memory_space<vmem>>, vector<1x32x32xf32>
      %129 = vector.shape_cast %128 : vector<1x32x32xf32> to vector<32x32xf32>
      %130 = arith.truncf %129 : vector<32x32xf32> to vector<32x32xbf16>
      %cst_65 = arith.constant dense<0.000000e+00> : vector<8x32xf32>
      %131 = tpu.matmul %115, %130, %cst_65 {dimension_numbers = #tpu.dot_dimension_numbers<[1], [0], [0], [1], [0, 0, 1, 1], [], []>} : vector<8x32xbf16>, vector<32x32xbf16>, vector<8x32xf32> -> vector<8x32xf32>
      %c2_66 = arith.constant 2 : index
      %c0_67 = arith.constant 0 : index
      %c0_68 = arith.constant 0 : index
      %132 = vector.load %arg7[%c2_66, %c0_67, %c0_68] : memref<4x1x32xf32, #tpu.memory_space<vmem>>, vector<1x1x32xf32>
      %133 = vector.shape_cast %132 : vector<1x1x32xf32> to vector<1x32xf32>
      %134 = vector.broadcast %133 : vector<1x32xf32> to vector<8x32xf32>
      %135 = arith.addf %131, %134 : vector<8x32xf32>
      %136 = arith.truncf %135 : vector<8x32xf32> to vector<8x32xbf16>
      %c1_69 = arith.constant 1 : index
      %c0_70 = arith.constant 0 : index
      %c0_71 = arith.constant 0 : index
      %137 = vector.load %arg10[%c1_69, %c0_70, %c0_71] : memref<2x8x32xbf16, #tpu.memory_space<vmem>>, vector<1x8x32xbf16>
      %138 = vector.shape_cast %137 : vector<1x8x32xbf16> to vector<8x32xbf16>
      %139 = vector.shape_cast %136 : vector<8x32xbf16> to vector<1x8x32xbf16>
      tpu.vector_store %arg10[%c1_69, %c0_70, %c0_71], %139 {strides = array<i32>} : memref<2x8x32xbf16, #tpu.memory_space<vmem>>, vector<1x8x32xbf16>,
    } else {
    }
    %c0 = arith.constant 0 : index
    %c0_1 = arith.constant 0 : index
    %c0_2 = arith.constant 0 : index
    %3 = vector.load %arg2[%c0, %c0_1, %c0_2] : memref<1x8x32xf32, #tpu.memory_space<vmem>>, vector<1x8x32xf32>
    %4 = vector.shape_cast %3 : vector<1x8x32xf32> to vector<8x32xf32>
    %5 = arith.truncf %4 : vector<8x32xf32> to vector<8x32xbf16>
    %c0_3 = arith.constant 0 : index
    %c0_4 = arith.constant 0 : index
    %c0_5 = arith.constant 0 : index
    %6 = vector.load %arg6[%c0_3, %c0_4, %c0_5] : memref<4x32x32xf32, #tpu.memory_space<vmem>>, vector<1x32x32xf32>
    %7 = vector.shape_cast %6 : vector<1x32x32xf32> to vector<32x32xf32>
    %8 = arith.truncf %7 : vector<32x32xf32> to vector<32x32xbf16>
    %cst = arith.constant dense<0.000000e+00> : vector<8x32xf32>
    %9 = tpu.matmul %5, %8, %cst {dimension_numbers = #tpu.dot_dimension_numbers<[1], [0], [0], [1], [0, 0, 1, 1], [], []>} : vector<8x32xbf16>, vector<32x32xbf16>, vector<8x32xf32> -> vector<8x32xf32>
    %c0_6 = arith.constant 0 : index
    %c0_7 = arith.constant 0 : index
    %c0_8 = arith.constant 0 : index
    %10 = vector.load %arg7[%c0_6, %c0_7, %c0_8] : memref<4x1x32xf32, #tpu.memory_space<vmem>>, vector<1x1x32xf32>
    %11 = vector.shape_cast %10 : vector<1x1x32xf32> to vector<1x32xf32>
    %12 = vector.broadcast %11 : vector<1x32xf32> to vector<8x32xf32>
    %13 = arith.addf %9, %12 : vector<8x32xf32>
    %14 = arith.truncf %13 : vector<8x32xf32> to vector<8x32xbf16>
    %c0_9 = arith.constant 0 : index
    %c0_10 = arith.constant 0 : index
    %c0_11 = arith.constant 0 : index
    %15 = vector.load %arg10[%c0_9, %c0_10, %c0_11] : memref<2x8x32xbf16, #tpu.memory_space<vmem>>, vector<1x8x32xbf16>
    %16 = vector.shape_cast %15 : vector<1x8x32xbf16> to vector<8x32xbf16>
    %c1 = arith.constant 1 : index
    %c0_12 = arith.constant 0 : index
    %c0_13 = arith.constant 0 : index
    %17 = vector.load %arg10[%c1, %c0_12, %c0_13] : memref<2x8x32xbf16, #tpu.memory_space<vmem>>, vector<1x8x32xbf16>
    %18 = vector.shape_cast %17 : vector<1x8x32xbf16> to vector<8x32xbf16>
    %c0_14 = arith.constant 0 : index
    %c0_15 = arith.constant 0 : index
    %c0_16 = arith.constant 0 : index
    %19 = vector.load %arg5[%c0_14, %c0_15, %c0_16] : memref<1x1x8xf32, #tpu.memory_space<vmem>>, vector<1x1x8xf32>
    %20 = vector.shape_cast %19 : vector<1x1x8xf32> to vector<1x8xf32>
    %21 = vector.shape_cast %20 : vector<1x8xf32> to vector<1x8xf32>
    %22 = vector.broadcast %21 : vector<1x8xf32> to vector<8x8xf32>
    %cst_17 = arith.constant 0.000000e+00 : f32
    %23 = vector.broadcast %cst_17 : f32 to vector<8x8xf32>
    %24 = vector.extract_strided_slice %14 {offsets = [0, 0], sizes = [8, 8], strides = [1, 1]} : vector<8x32xbf16> to vector<8x8xbf16>
    %25 = vector.extract_strided_slice %16 {offsets = [0, 0], sizes = [8, 8], strides = [1, 1]} : vector<8x32xbf16> to vector<8x8xbf16>
    %cst_18 = arith.constant dense<0.000000e+00> : vector<8x8xf32>
    %26 = tpu.matmul %24, %25, %cst_18 {dimension_numbers = #tpu.dot_dimension_numbers<[1], [1], [0], [0], [0, 0, 1, 0], [], []>} : vector<8x8xbf16>, vector<8x8xbf16>, vector<8x8xf32> -> vector<8x8xf32>
    %27 = arith.addf %26, %22 : vector<8x8xf32>
    %cst_19 = arith.constant dense<0xFF800000> : vector<8xf32>
    %28 = vector.multi_reduction <maximumf>, %27, %cst_19 [1] : vector<8x8xf32> to vector<8xf32>
    %29 = vector.shape_cast %28 : vector<8xf32> to vector<8x1xf32>
    %30 = vector.broadcast %29 : vector<8x1xf32> to vector<8x8xf32>
    %31 = arith.subf %27, %30 : vector<8x8xf32>
    %32 = math.exp %31 : vector<8x8xf32>
    %cst_20 = arith.constant dense<0.000000e+00> : vector<8xf32>
    %33 = vector.multi_reduction <add>, %32, %cst_20 [1] : vector<8x8xf32> to vector<8xf32>
    %34 = vector.shape_cast %33 : vector<8xf32> to vector<8x1xf32>
    %35 = vector.broadcast %34 : vector<8x1xf32> to vector<8x8xf32>
    %36 = arith.divf %32, %35 : vector<8x8xf32>
    %37 = arith.addf %23, %36 : vector<8x8xf32>
    %38 = arith.truncf %36 : vector<8x8xf32> to vector<8x8xbf16>
    %39 = vector.extract_strided_slice %18 {offsets = [0, 0], sizes = [8, 8], strides = [1, 1]} : vector<8x32xbf16> to vector<8x8xbf16>
    %cst_21 = arith.constant dense<0.000000e+00> : vector<8x8xf32>
    %40 = tpu.matmul %38, %39, %cst_21 {dimension_numbers = #tpu.dot_dimension_numbers<[1], [0], [0], [1], [0, 0, 1, 1], [], []>} : vector<8x8xbf16>, vector<8x8xbf16>, vector<8x8xf32> -> vector<8x8xf32>
    %41 = vector.extract_strided_slice %14 {offsets = [0, 8], sizes = [8, 8], strides = [1, 1]} : vector<8x32xbf16> to vector<8x8xbf16>
    %42 = vector.extract_strided_slice %16 {offsets = [0, 8], sizes = [8, 8], strides = [1, 1]} : vector<8x32xbf16> to vector<8x8xbf16>
    %cst_22 = arith.constant dense<0.000000e+00> : vector<8x8xf32>
    %43 = tpu.matmul %41, %42, %cst_22 {dimension_numbers = #tpu.dot_dimension_numbers<[1], [1], [0], [0], [0, 0, 1, 0], [], []>} : vector<8x8xbf16>, vector<8x8xbf16>, vector<8x8xf32> -> vector<8x8xf32>
    %44 = arith.addf %43, %22 : vector<8x8xf32>
    %cst_23 = arith.constant dense<0xFF800000> : vector<8xf32>
    %45 = vector.multi_reduction <maximumf>, %44, %cst_23 [1] : vector<8x8xf32> to vector<8xf32>
    %46 = vector.shape_cast %45 : vector<8xf32> to vector<8x1xf32>
    %47 = vector.broadcast %46 : vector<8x1xf32> to vector<8x8xf32>
    %48 = arith.subf %44, %47 : vector<8x8xf32>
    %49 = math.exp %48 : vector<8x8xf32>
    %cst_24 = arith.constant dense<0.000000e+00> : vector<8xf32>
    %50 = vector.multi_reduction <add>, %49, %cst_24 [1] : vector<8x8xf32> to vector<8xf32>
    %51 = vector.shape_cast %50 : vector<8xf32> to vector<8x1xf32>
    %52 = vector.broadcast %51 : vector<8x1xf32> to vector<8x8xf32>
    %53 = arith.divf %49, %52 : vector<8x8xf32>
    %54 = arith.addf %37, %53 : vector<8x8xf32>
    %55 = arith.truncf %53 : vector<8x8xf32> to vector<8x8xbf16>
    %56 = vector.extract_strided_slice %18 {offsets = [0, 8], sizes = [8, 8], strides = [1, 1]} : vector<8x32xbf16> to vector<8x8xbf16>
    %cst_25 = arith.constant dense<0.000000e+00> : vector<8x8xf32>
    %57 = tpu.matmul %55, %56, %cst_25 {dimension_numbers = #tpu.dot_dimension_numbers<[1], [0], [0], [1], [0, 0, 1, 1], [], []>} : vector<8x8xbf16>, vector<8x8xbf16>, vector<8x8xf32> -> vector<8x8xf32>
    %58 = vector.extract_strided_slice %14 {offsets = [0, 16], sizes = [8, 8], strides = [1, 1]} : vector<8x32xbf16> to vector<8x8xbf16>
    %59 = vector.extract_strided_slice %16 {offsets = [0, 16], sizes = [8, 8], strides = [1, 1]} : vector<8x32xbf16> to vector<8x8xbf16>
    %cst_26 = arith.constant dense<0.000000e+00> : vector<8x8xf32>
    %60 = tpu.matmul %58, %59, %cst_26 {dimension_numbers = #tpu.dot_dimension_numbers<[1], [1], [0], [0], [0, 0, 1, 0], [], []>} : vector<8x8xbf16>, vector<8x8xbf16>, vector<8x8xf32> -> vector<8x8xf32>
    %61 = arith.addf %60, %22 : vector<8x8xf32>
    %cst_27 = arith.constant dense<0xFF800000> : vector<8xf32>
    %62 = vector.multi_reduction <maximumf>, %61, %cst_27 [1] : vector<8x8xf32> to vector<8xf32>
    %63 = vector.shape_cast %62 : vector<8xf32> to vector<8x1xf32>
    %64 = vector.broadcast %63 : vector<8x1xf32> to vector<8x8xf32>
    %65 = arith.subf %61, %64 : vector<8x8xf32>
    %66 = math.exp %65 : vector<8x8xf32>
    %cst_28 = arith.constant dense<0.000000e+00> : vector<8xf32>
    %67 = vector.multi_reduction <add>, %66, %cst_28 [1] : vector<8x8xf32> to vector<8xf32>
    %68 = vector.shape_cast %67 : vector<8xf32> to vector<8x1xf32>
    %69 = vector.broadcast %68 : vector<8x1xf32> to vector<8x8xf32>
    %70 = arith.divf %66, %69 : vector<8x8xf32>
    %71 = arith.addf %54, %70 : vector<8x8xf32>
    %72 = arith.truncf %70 : vector<8x8xf32> to vector<8x8xbf16>
    %73 = vector.extract_strided_slice %18 {offsets = [0, 16], sizes = [8, 8], strides = [1, 1]} : vector<8x32xbf16> to vector<8x8xbf16>
    %cst_29 = arith.constant dense<0.000000e+00> : vector<8x8xf32>
    %74 = tpu.matmul %72, %73, %cst_29 {dimension_numbers = #tpu.dot_dimension_numbers<[1], [0], [0], [1], [0, 0, 1, 1], [], []>} : vector<8x8xbf16>, vector<8x8xbf16>, vector<8x8xf32> -> vector<8x8xf32>
    %75 = vector.extract_strided_slice %14 {offsets = [0, 24], sizes = [8, 8], strides = [1, 1]} : vector<8x32xbf16> to vector<8x8xbf16>
    %76 = vector.extract_strided_slice %16 {offsets = [0, 24], sizes = [8, 8], strides = [1, 1]} : vector<8x32xbf16> to vector<8x8xbf16>
    %cst_30 = arith.constant dense<0.000000e+00> : vector<8x8xf32>
    %77 = tpu.matmul %75, %76, %cst_30 {dimension_numbers = #tpu.dot_dimension_numbers<[1], [1], [0], [0], [0, 0, 1, 0], [], []>} : vector<8x8xbf16>, vector<8x8xbf16>, vector<8x8xf32> -> vector<8x8xf32>
    %78 = arith.addf %77, %22 : vector<8x8xf32>
    %cst_31 = arith.constant dense<0xFF800000> : vector<8xf32>
    %79 = vector.multi_reduction <maximumf>, %78, %cst_31 [1] : vector<8x8xf32> to vector<8xf32>
    %80 = vector.shape_cast %79 : vector<8xf32> to vector<8x1xf32>
    %81 = vector.broadcast %80 : vector<8x1xf32> to vector<8x8xf32>
    %82 = arith.subf %78, %81 : vector<8x8xf32>
    %83 = math.exp %82 : vector<8x8xf32>
    %cst_32 = arith.constant dense<0.000000e+00> : vector<8xf32>
    %84 = vector.multi_reduction <add>, %83, %cst_32 [1] : vector<8x8xf32> to vector<8xf32>
    %85 = vector.shape_cast %84 : vector<8xf32> to vector<8x1xf32>
    %86 = vector.broadcast %85 : vector<8x1xf32> to vector<8x8xf32>
    %87 = arith.divf %83, %86 : vector<8x8xf32>
    %88 = arith.addf %71, %87 : vector<8x8xf32>
    %89 = arith.truncf %87 : vector<8x8xf32> to vector<8x8xbf16>
    %90 = vector.extract_strided_slice %18 {offsets = [0, 24], sizes = [8, 8], strides = [1, 1]} : vector<8x32xbf16> to vector<8x8xbf16>
    %cst_33 = arith.constant dense<0.000000e+00> : vector<8x8xf32>
    %91 = tpu.matmul %89, %90, %cst_33 {dimension_numbers = #tpu.dot_dimension_numbers<[1], [0], [0], [1], [0, 0, 1, 1], [], []>} : vector<8x8xbf16>, vector<8x8xbf16>, vector<8x8xf32> -> vector<8x8xf32>
    %92 = tpu.concatenate %40, %57, %74, %91 in 1 : vector<8x8xf32>, vector<8x8xf32>, vector<8x8xf32>, vector<8x8xf32> -> vector<8x32xf32>
    %93 = arith.truncf %92 : vector<8x32xf32> to vector<8x32xbf16>
    %c3 = arith.constant 3 : index
    %c0_34 = arith.constant 0 : index
    %c0_35 = arith.constant 0 : index
    %94 = vector.load %arg6[%c3, %c0_34, %c0_35] : memref<4x32x32xf32, #tpu.memory_space<vmem>>, vector<1x32x32xf32>
    %95 = vector.shape_cast %94 : vector<1x32x32xf32> to vector<32x32xf32>
    %96 = arith.truncf %95 : vector<32x32xf32> to vector<32x32xbf16>
    %cst_36 = arith.constant dense<0.000000e+00> : vector<8x32xf32>
    %97 = tpu.matmul %93, %96, %cst_36 {dimension_numbers = #tpu.dot_dimension_numbers<[1], [0], [0], [1], [0, 0, 1, 1], [], []>} : vector<8x32xbf16>, vector<32x32xbf16>, vector<8x32xf32> -> vector<8x32xf32>
    %c3_37 = arith.constant 3 : index
    %c0_38 = arith.constant 0 : index
    %c0_39 = arith.constant 0 : index
    %98 = vector.load %arg7[%c3_37, %c0_38, %c0_39] : memref<4x1x32xf32, #tpu.memory_space<vmem>>, vector<1x1x32xf32>
    %99 = vector.shape_cast %98 : vector<1x1x32xf32> to vector<1x32xf32>
    %100 = vector.broadcast %99 : vector<1x32xf32> to vector<8x32xf32>
    %101 = arith.addf %97, %100 : vector<8x32xf32>
    %c0_40 = arith.constant 0 : index
    %c0_41 = arith.constant 0 : index
    %c0_42 = arith.constant 0 : index
    %102 = vector.load %arg8[%c0_40, %c0_41, %c0_42] : memref<1x8x32xf32, #tpu.memory_space<vmem>>, vector<1x8x32xf32>
    %103 = vector.shape_cast %102 : vector<1x8x32xf32> to vector<8x32xf32>
    %104 = vector.shape_cast %101 : vector<8x32xf32> to vector<1x8x32xf32>
    tpu.vector_store %arg8[%c0_40, %c0_41, %c0_42], %104 {strides = array<i32>} : memref<1x8x32xf32, #tpu.memory_space<vmem>>, vector<1x8x32xf32>,
    %cst_43 = arith.constant 2.500000e-01 : f32
    %105 = vector.broadcast %cst_43 : f32 to vector<8x8xf32>
    %106 = arith.mulf %88, %105 : vector<8x8xf32>
    %c0_44 = arith.constant 0 : index
    %c0_45 = arith.constant 0 : index
    %c0_46 = arith.constant 0 : index
    %107 = vector.load %arg9[%c0_44, %c0_45, %c0_46] : memref<1x8x8xf32, #tpu.memory_space<vmem>>, vector<1x8x8xf32>
    %108 = vector.shape_cast %107 : vector<1x8x8xf32> to vector<8x8xf32>
    %109 = vector.shape_cast %106 : vector<8x8xf32> to vector<1x8x8xf32>
    tpu.vector_store %arg9[%c0_44, %c0_45, %c0_46], %109 {strides = array<i32>} : memref<1x8x8xf32, #tpu.memory_space<vmem>>, vector<1x8x8xf32>,
    return
  }
  func.func @transform_0(%arg0: i32, %arg1: i32) -> (i32, i32, i32) {
    %c0_i32 = arith.constant 0 : i32
    %c0_i32_0 = arith.constant 0 : i32
    return %arg0, %arg1, %c0_i32 : i32, i32, i32
  }
  func.func @transform_1(%arg0: i32, %arg1: i32) -> (i32, i32, i32) {
    %c0_i32 = arith.constant 0 : i32
    %c0_i32_0 = arith.constant 0 : i32
    %c0_i32_1 = arith.constant 0 : i32
    return %arg0, %c0_i32, %c0_i32_0 : i32, i32, i32
  }
  func.func @transform_2(%arg0: i32, %arg1: i32) -> (i32, i32, i32) {
    %c0_i32 = arith.constant 0 : i32
    %c0_i32_0 = arith.constant 0 : i32
    %c0_i32_1 = arith.constant 0 : i32
    return %arg0, %c0_i32, %c0_i32_0 : i32, i32, i32
  }
  func.func @transform_3(%arg0: i32, %arg1: i32) -> (i32, i32, i32) {
    %c0_i32 = arith.constant 0 : i32
    %c0_i32_0 = arith.constant 0 : i32
    %c0_i32_1 = arith.constant 0 : i32
    return %arg0, %c0_i32, %c0_i32_0 : i32, i32, i32
  }
  func.func @transform_4(%arg0: i32, %arg1: i32) -> (i32, i32, i32) {
    %c0_i32 = arith.constant 0 : i32
    %c0_i32_0 = arith.constant 0 : i32
    %c0_i32_1 = arith.constant 0 : i32
    %c0_i32_2 = arith.constant 0 : i32
    return %c0_i32, %c0_i32_0, %c0_i32_1 : i32, i32, i32
  }
  func.func @transform_5(%arg0: i32, %arg1: i32) -> (i32, i32, i32) {
    %c0_i32 = arith.constant 0 : i32
    %c0_i32_0 = arith.constant 0 : i32
    %c0_i32_1 = arith.constant 0 : i32
    %c0_i32_2 = arith.constant 0 : i32
    return %c0_i32, %c0_i32_0, %c0_i32_1 : i32, i32, i32
  }
  func.func @transform_6(%arg0: i32, %arg1: i32) -> (i32, i32, i32) {
    %c0_i32 = arith.constant 0 : i32
    %c0_i32_0 = arith.constant 0 : i32
    return %arg0, %arg1, %c0_i32 : i32, i32, i32
  }
  func.func @transform_7(%arg0: i32, %arg1: i32) -> (i32, i32, i32) {
    %c0_i32 = arith.constant 0 : i32
    %c0_i32_0 = arith.constant 0 : i32
    return %arg0, %arg1, %c0_i32 : i32, i32, i32
  }
}

</mosaic_0001>

<bundles_post_ra>
// kernel: multi_headed_attention.1
= control target key start
LH: loop header
LB: loop body
LE: loop exit
PB: predicated region body
PF: predicated region fallthrough
CT: control target
= control target key end

     0   :  { %13 = vsyncpa [#allocation4], 0  ;;  %s1976_s0 = inlined_call_operand.vmem [shape: f32[2,8,32], index: 0, kind: input, shape index: {}]   ;;  %s1977_s1 = inlined_call_operand.vmem [shape: f32[2,8,32], index: 1, kind: input, shape index: {}]   ;;  %s1978_s2 = inlined_call_operand.vmem [shape: f32[2,8,32], index: 2, kind: input, shape index: {}]   ;;  %s1979_s3 = inlined_call_operand.vmem [shape: f32[2,1,8], index: 3, kind: input, shape index: {}]   ;;  %s1980_s4 = inlined_call_operand.vmem [shape: f32[4,32,32], index: 4, kind: input, shape index: {}]   ;;  %s1981_s5 = inlined_call_operand.vmem [shape: f32[4,1,32], index: 5, kind: input, shape index: {}]   ;;  %s1982_s6 = inlined_call_operand.hbm [shape: f32[2,8,32], index: 6, kind: output, shape index: {0}]   ;;  %s1983_s7 = inlined_call_operand.hbm [shape: f32[2,8,8], index: 7, kind: output, shape index: {1}]  }
   0x1   :  { %15 = vsyncpa [#allocation4 + $0x1], 0 }
   0x2   :  { %16 = vsyncpa [#allocation6], 0 }
   0x3   :  { %18 = vsyncpa [#allocation6 + $0x1], 0  ;;  %s1665_s24 = smov 0   ;;  %s1667_s25 = smov 0  }
   0x4   :  { %s1669_s26 = smov 0   ;;  %s1671_s27 = smov 0  }
   0x5   :  { %s1673_s28 = smov 0   ;;  %s1675_s29 = smov 0  }
   0x6 LB: > { %s1259_s30 = sadd.s32 4294967295, %s1613_s29   ;;  %s1260_s8 = sadd.s32 4294967294, %s1613_s29   ;;  %s1613_s29 = sphi %s1675_s29, %s24_s29   ;;  %s1609_s28 = sphi %s1673_s28, %s1992_s28   ;;  %s1605_s27 = sphi %s1671_s27, %s1991_s27   ;;  %s1601_s26 = sphi %s1669_s26, %s1990_s26   ;;  %s1597_s25 = sphi %s1667_s25, %s1989_s25   ;;  %s1593_s24 = sphi %s1665_s24, %s1988_s24  }
   0x7   : > { %s36_s9 = sadd.s32 1, %s1609_s28  ;;  %s193_s10 = sadd.s32 1, %s1601_s26 }
   0x8   : > { %p38_p0 = scmp.ge.s32.totalorder %s36_s9, 2  ;;  %p203_p1 = scmp.ne.s32.totalorder %s1601_s26, %s1597_s25 }
   0x9   : > { %p204_p2 = scmp.eq.s32.totalorder %s1259_s30, 1  ;;  %p209_p3 = scmp.ne.s32.totalorder %s1597_s25, %s1593_s24 }
   0xa   : > { %s1994_s9 = smov (%p38_p0, %s36_s9), 0  ;;  %p210_p5 = scmp.eq.s32.totalorder %s1260_s8, 1 }
   0xb   : > { %p1705_p4 = por %p204_p2, %p203_p1  ;;  %s188_s12 = ssub.s32 %s1609_s28, %s1994_s9 }
   0xc   : > { %p1263_p6 = scmp.ge.s32.totalorder %s1613_s29, 1  ;;  %p191_p7 = scmp.eq.s32.totalorder %s188_s12, 0 }
   0xd   : > { %p1712_p8 = por %p210_p5, %p209_p3  ;;  %p292_p9 = scmp.lt.s32.totalorder %s1613_s29, 3 }
   0xe   : > { %s1718_s14 = scalar_select %p191_p7, %s1601_s26, %s193_s10  }
   0xf   : > { %p293_p10 = pnand %p1263_p6, %p292_p9 }
  0x10   : > { %v1269_v0 = vld [vmem:[%s1980_s4 + $0x20] sm:$0xff] (!%p293_p10)  ;;  %v1270_v1 = vld [vmem:[%s1980_s4 + $0x28] sm:$0xff] (!%p293_p10)  ;;  %v1271_v2 = vld [vmem:[%s1980_s4 + $0x30] sm:$0xff] (!%p293_p10)  ;;  %p342_p11 = scmp.lt.s32.totalorder (!%p293_p10), %s1605_s27, 1  ;;  %v1615_v3 = vmov (!%p293_p10), 0.0   ;;  %vm1616_vm0 = vmmov (!%p293_p10), 0  }
  0x11   : > { %296 = sbr.rel (%p293_p10) target bundleno = 1485 (0x5cd), region = 44  ;;  %1337 = vmatprep.subr.bf16.mxu0 (!%p293_p10), %v1615_v3  ;;  %v374_v4 = vpack.c.bf16 (!%p293_p10), %v1270_v1, %v1269_v0  ;;  %v1272_v5 = vld [vmem:[%s1980_s4 + $0x38] sm:$0xff] (!%p293_p10)  ;;  %1341 = vmatprep.mubr.msk.bf16.mxu0 (!%p293_p10), %vm1616_vm0, %v1615_v3  ;;  %v494_v7 = vld [vmem:[%s1980_s4] sm:$0xff] (!%p293_p10)  ;;  %v495_v8 = vld [vmem:[%s1980_s4 + $0x8] sm:$0xff] (!%p293_p10)  ;;  %vm384_vm1 = vcmask (!%p293_p10), 261120   ;;  %vm429_vm2 = vcmask (!%p293_p10), 257024  }
  0x12   : > { %1345 = vmatprep.subr.bf16.mxu1 (!%p293_p10), %v1615_v3  ;;  %1349 = vmatprep.mubr.msk.bf16.mxu1 (!%p293_p10), %vm1616_vm0, %v1615_v3  ;;  %v375_v6 = vpack.c.bf16 (!%p293_p10), %v1272_v5, %v1271_v2  ;;  %v498_v11 = vpack.c.bf16 (!%p293_p10), %v495_v8, %v494_v7  ;;  %v496_v12 = vld [vmem:[%s1980_s4 + $0x10] sm:$0xff] (!%p293_p10)  ;;  %v497_v13 = vld [vmem:[%s1980_s4 + $0x18] sm:$0xff] (!%p293_p10)  ;;  %v1276_v17 = vld [vmem:[%s1980_s4 + $0x40] sm:$0xff] (!%p293_p10)  ;;  %vm562_vm3 = vcmask (!%p293_p10), 64512   ;;  %s1618_s19 = smov (!%p293_p10), 120   ;;  %s1619_s20 = smov (!%p293_p10), 104  }
  0x13   : > { %1338 = vmatpush3.bf16.msra.mxu0 (!%p293_p10), %v374_v4  ;;  %v499_v14 = vpack.c.bf16 (!%p293_p10), %v497_v13, %v496_v12  ;;  %v1277_v18 = vld [vmem:[%s1980_s4 + $0x48] sm:$0xff] (!%p293_p10)  ;;  %v1278_v20 = vld [vmem:[%s1980_s4 + $0x50] sm:$0xff] (!%p293_p10)  ;;  %v1279_v21 = vld [vmem:[%s1980_s4 + $0x58] sm:$0xff] (!%p293_p10)  ;;  %vm625_vm4 = vcmask (!%p293_p10), 1043456   ;;  %vm1022_vm5 = vcmask (!%p293_p10), 130048   ;;  %vm1024_vm6 = vcmask (!%p293_p10), 195584  }
  0x14   : > { %1339 = vmatprep.subr.bf16.mxu0 (!%p293_p10), %v1615_v3  ;;  %v436_v19 = vpack.c.bf16 (!%p293_p10), %v1277_v18, %v1276_v17  ;;  %v437_v22 = vpack.c.bf16 (!%p293_p10), %v1279_v21, %v1278_v20  ;;  %v1274_v25 = vld [vmem:[%s1981_s5 + $0x1] ss:$0 sm:$0xff] (!%p293_p10)  ;;  %v1283_v32 = vld [vmem:[%s1981_s5] ss:$0 sm:$0xff] (!%p293_p10)  ;;  %v1281_v42 = vld [vmem:[%s1981_s5 + $0x2] ss:$0 sm:$0xff] (!%p293_p10) }
  0x15   : > { %s1984_s17 = sshll.u32 (!%p293_p10), %s1605_s27, 7  ;;  %s1623_s10 = smov (!%p293_p10), [#allocation5]  }
  0x16   : > { %1346 = vmatpush3.bf16.msra.mxu1 (!%p293_p10), %v436_v19 }
  0x17   : > { %1340 = vmatpush3.bf16.msra.mxu0 (!%p293_p10), %v375_v6  ;;  %1347 = vmatprep.subr.bf16.mxu1 (!%p293_p10), %v1615_v3 }
  0x18   : > { %s1737_s23 = scalar_select %p342_p11, %s1605_s27, 1  ;;  %1353 = vmatprep.subr.bf16.mxu0 %v1615_v3 }
  0x1a   : > { %s1744_s30 = sshll.u32 %s1737_s23, 3  ;;  %1348 = vmatpush3.bf16.msra.mxu1 %v437_v22 }
  0x1b   : > { %s352_s18 = scalar_lea.vmem %s1977_s1, %s1744_s30  ;;  %s348_s12 = scalar_lea.vmem %s1976_s0, %s1744_s30  ;;  %1361 = vmatprep.subr.bf16.mxu1 %v1615_v3 }
  0x1c   : > { %v365_v9 = vld [vmem:[%s352_s18] sm:$0xff]  ;;  %s1617_s18 = smov 112  }
  0x1d   : > { %v366_v10 = vpack.c.bf16 %v365_v9, %v365_v9  ;;  %v492_v15 = vld [vmem:[%s348_s12] sm:$0xff]  ;;  %s356_s12 = scalar_lea.vmem %s1978_s2, %s1744_s30  ;;  %s1622_s30 = smov 24  }
  0x1e   : > { %v493_v16 = vpack.c.bf16 %v492_v15, %v492_v15  ;;  %v367_v23 = vld [vmem:[%s356_s12] sm:$0xff]  ;;  %s359_s12 = scalar_lea.vmem %s1979_s3, %s1737_s23  ;;  %s1863_s23 = sand.u32 1, %s1597_s25  }
  0x1f   : > { %1342 = vmatmul.mubr.msk.bf16.vlgmr.msra.gmra.mrb[0].mxu0 %vm384_vm1, %v366_v10  ;;  %v368_v24 = vpack.c.bf16 %v367_v23, %v367_v23  ;;  %v1285_v60 = vld [vmem:[%s359_s12] ss:$0 sm:$0xff]  ;;  %s1264_s15 = sshll.u32 %s1863_s23, 3  ;;  %s1621_s12 = smov 16  }
  0x20   : > { %1354 = vmatpush3.bf16.msra.mxu0 %v498_v11  ;;  %1357 = vmatprep.mubr.msk.bf16.mxu0 %vm1616_vm0, %v1615_v3  ;;  %s1871_s16 = scalar_lea.vmem [#allocation5], %s1264_s15  ;;  %s1094_s22 = scalar_lea.sflag [#allocation6], %s1863_s23 }
  0x21   : > { %1355 = vmatprep.subr.bf16.mxu0 %v1615_v3  ;;  %1350 = vmatmul.mubr.msk.bf16.vlgmr.msra.gmra.mrb[0].mxu1 %vm384_vm1, %v368_v24  ;;  %s1122_s21 = sshll.u32 %s1871_s16, 4  ;;  %s1123_s21 = int_to_ptr.vmem [resolvable:$true] %s1122_s21 }
  0x22   : > { %1363 = vmatprep.mubr.msk.bf16.mxu1 %vm1616_vm0, %v1615_v3  ;;  %s1503_s8 = scalar_lea.vmem %s1123_s21, 128 }
  0x23   : > { %p1504_p12 = scmp.ne.s32.totalorder %s1123_s21, %s1503_s8 }
  0x24   : > { %1356 = vmatpush3.bf16.msra.mxu0 %v499_v14 }
  0x25   : > { %1367 = vmatprep.subr.bf16.mxu0 %v1615_v3  ;;  %p1505_p13 = pnand %p1504_p12, %p1705_p4 }
  0x27   : > { %1358 = vmatmul.mubr.msk.bf16.vlgmr.msra.gmra.mrb[4].mxu0 %vm384_vm1, %v493_v16  ;;  %p1506_p0 = pneg %p1505_p13 }
  0x28   : > { %1369 = vmatprep.mubr.msk.bf16.mxu0 %vm1616_vm0, %v1615_v3 }
  0xf2   : > { %v422_v26 = vpop.f32.mrb[0].mxu0 }
  0xf3   : > { %v423_v27 = vadd.f32 %v1274_v25, %v422_v26  ;;  %v1343_v28 = vpop.f32.mrb[1].mxu0 }
  0xf4   : > { %v425_v29 = vpop.f32.mrb[2].mxu0  ;;  %v483_v43 = vpop.f32.mrb[0].mxu1 }
  0xf5   : > { %v428_v30 = vpack.c.bf16 %v423_v27, %v423_v27  ;;  %v1344_v31 = vpop.f32.mrb[3].mxu0  ;;  %v484_v44 = vadd.f32 %v1281_v42, %v483_v43  ;;  %v1351_v45 = vpop.f32.mrb[1].mxu1 }
  0xf6   : > { %v486_v46 = vpop.f32.mrb[2].mxu1 }
  0xf7   : > { %430 = vst.msk [vmem:[#allocation2] sm:$0xf] %vm429_vm2, %v428_v30  ;;  %v489_v47 = vpack.c.bf16 %v484_v44, %v484_v44  ;;  %v1352_v48 = vpop.f32.mrb[3].mxu1 }
  0xf9   : > { %491 = vst.msk [vmem:[#allocation2 + $0x4] sm:$0xf] %vm429_vm2, %v489_v47 }
  0xfa   : > { %v545_v33 = vpop.f32.mrb[4].mxu0 }
  0xfb   : > { %v1359_v34 = vpop.f32.mrb[5].mxu0  ;;  %v546_v36 = vadd.f32 %v1283_v32, %v545_v33 }
  0xfc   : > { %v548_v35 = vpop.f32.mrb[6].mxu0 }
  0xfd   : > { %v1360_v37 = vpop.f32.mrb[7].mxu0  ;;  %v551_v41 = vpack.c.bf16 %v546_v36, %v546_v36 }
  0xfe   : > { %v552_v38 = vld [vmem:[#allocation2] sm:$0xf] }
  0xff   : > { %v567_v39 = vsel %vm562_vm3, %v552_v38, 0  ;;  %v1288_v40 = vcombine.low %v552_v38, %v552_v38 }
 0x100   : > { %1362 = vmatpush3.bf16.xpose.msra.mxu1 %v567_v39  ;;  %v554_v49 = vld [vmem:[#allocation2 + $0x4] sm:$0xf] }
 0x101   : > { %789 = vrot.lane.b32.xlu1 %v1288_v40, %s1617_s18  ;;  %675 = vrot.lane.b32.xlu0 %v1288_v40, %s1618_s19  ;;  %v627_v50 = vsel %vm625_vm4, %v554_v49, 0  ;;  %v1290_v27 = vcombine.low %v554_v49, %v554_v49 }
 0x102   : > { %1373 = vmatprep.subr.bf16.mxu1 %v1615_v3  ;;  %1368 = vmatpush3.bf16.msra.mxu0 %v627_v50 }
 0x103   : > { %1379 = vmatprep.subr.bf16.mxu0 %v1615_v3 }
 0x105   : > { %787 = vrot.lane.b32.xlu1 %v551_v41, %s1617_s18  ;;  %670 = vrot.lane.b32.xlu0 %v551_v41, %s1618_s19 }
 0x107   : > { %1364 = vmatmul.mubr.msk.bf16.vlgmr.msra.gmra.mrb[4].mxu1 %vm562_vm3, %v551_v41 }
 0x108   : > { %1375 = vmatprep.mubr.msk.bf16.mxu1 %vm1616_vm0, %v1615_v3 }
 0x109   : > { %898 = vrot.lane.b32.xlu1 %v551_v41, %s1619_s20  ;;  %900 = vrot.lane.b32.xlu0 %v1288_v40, %s1619_s20 }
 0x173   : > { %v676_v51 = vpop.permute.xlu0 %675  ;;  %v790_v53 = vpop.permute.xlu1 %789 }
 0x174   : > { %v681_v52 = vsel %vm562_vm3, %v676_v51, 0  ;;  %v795_v55 = vsel %vm562_vm3, %v790_v53, 0 }
 0x175   : > { %1374 = vmatpush3.bf16.xpose.msra.mxu1 %v681_v52 }
 0x176   : > { %1385 = vmatprep.subr.bf16.mxu1 %v1615_v3 }
 0x177   : > { %v671_v54 = vpop.permute.xlu0 %670  ;;  %v788_v57 = vpop.permute.xlu1 %787 }
 0x17b   : > { %v901_v56 = vpop.permute.xlu0 %900  ;;  %v899_v59 = vpop.permute.xlu1 %898 }
 0x17c   : > { %1376 = vmatmul.mubr.msk.bf16.vlgmr.msra.gmra.mrb[8].mxu1 %vm562_vm3, %v671_v54  ;;  %v906_v58 = vsel %vm562_vm3, %v901_v56, 0 }
 0x17d   : > { %1386 = vmatpush3.bf16.xpose.msra.mxu1 %v795_v55  ;;  %1387 = vmatprep.mubr.msk.bf16.mxu1 %vm1616_vm0, %v1615_v3 }
 0x17e   : > { %1397 = vmatprep.subr.bf16.mxu1 %v1615_v3 }
 0x184   : > { %1388 = vmatmul.mubr.msk.bf16.vlgmr.msra.gmra.mrb[12].mxu1 %vm562_vm3, %v788_v57 }
 0x185   : > { %1398 = vmatpush3.bf16.xpose.msra.mxu1 %v906_v58  ;;  %1399 = vmatprep.mubr.msk.bf16.mxu1 %vm1616_vm0, %v1615_v3 }
 0x186   : > { %1409 = vmatprep.subr.bf16.mxu1 %v1615_v3 }
 0x18c   : > { %1400 = vmatmul.mubr.msk.bf16.vlgmr.msra.gmra.mrb[16].mxu1 %vm562_vm3, %v899_v59 }
 0x18d   : > { %1413 = vmatprep.mubr.msk.bf16.mxu1 %vm1616_vm0, %v1615_v3 }
 0x1da   : > { %v603_v61 = vpop.f32.mrb[4].mxu1 }
 0x1db   : > { %v604_v62 = vadd.f32 %v1285_v60, %v603_v61  ;;  %v1365_v63 = vpop.f32.mrb[5].mxu1 }
 0x1dc   : > { %v606_v0 = vpop.f32.mrb[6].mxu1 }
 0x1dd   : > { %v1366_v1 = vpop.f32.mrb[7].mxu1  ;;  %v609_v2 = vsel %vm562_vm3, %v604_v62, -inf }
 0x1de   : > { %610 = vmax.xlane.f32.xlu0 %v609_v2 }
 0x24f   : > { %v717_v4 = vpop.f32.mrb[8].mxu1 }
 0x250   : > { %v718_v5 = vadd.f32 %v1285_v60, %v717_v4  ;;  %v1377_v6 = vpop.f32.mrb[9].mxu1 }
 0x251   : > { %v720_v7 = vpop.f32.mrb[10].mxu1 }
 0x252   : > { %v1378_v8 = vpop.f32.mrb[11].mxu1  ;;  %v723_v9 = vsel %vm562_vm3, %v718_v5, -inf }
 0x253   : > { %724 = vmax.xlane.f32.xlu1 %v723_v9 }
 0x257   : > { %v831_v10 = vpop.f32.mrb[12].mxu1 }
 0x258   : > { %v832_v11 = vadd.f32 %v1285_v60, %v831_v10  ;;  %v1389_v12 = vpop.f32.mrb[13].mxu1  ;;  %v1296_v10 = vld [vmem:[%s1980_s4 + $0x60] sm:$0xff] }
 0x259   : > { %v834_v13 = vpop.f32.mrb[14].mxu1 }
 0x25a   : > { %v1390_v14 = vpop.f32.mrb[15].mxu1  ;;  %v837_v15 = vsel %vm562_vm3, %v832_v11, -inf }
 0x25b   : > { %838 = vmax.xlane.f32.xlu0 %v837_v15 }
 0x25f   : > { %v942_v16 = vpop.f32.mrb[16].mxu1 }
 0x260   : > { %v943_v17 = vadd.f32 %v1285_v60, %v942_v16  ;;  %v1401_v18 = vpop.f32.mrb[17].mxu1 }
 0x261   : > { %v945_v19 = vpop.f32.mrb[18].mxu1  ;;  %v1299_v18 = vld [vmem:[%s1980_s4 + $0x78] sm:$0xff] }
 0x262   : > { %v1402_v20 = vpop.f32.mrb[19].mxu1  ;;  %v948_v21 = vsel %vm562_vm3, %v943_v17, -inf }
 0x263   : > { %949 = vmax.xlane.f32.xlu0 %v948_v21 }
 0x26b   : > { %v611_v22 = vpop.xlane.xlu0 %610 }
 0x26c   : > { %v612_v23 = vsub.f32 %v604_v62, %v611_v22 }
 0x26e   : > { %v613_v24 = vmul.f32 1.442695, %v612_v23 }
 0x270   : > { %1487 = vpow2.f32 %v613_v24 }
 0x27a   : > { %v1488_v25 = vpop.eup %1487 }
 0x27b   : > { %v615_v26 = vsel %vm562_vm3, %v1488_v25, 0.0 }
 0x27c   : > { %616 = vadd.xlane.f32.xlu1 %v615_v26 }
 0x28d   : > { %739 = vrot.lane.b32.xlu1 %v1290_v27, %s1618_s19 }
 0x2e0   : > { %v725_v28 = vpop.xlane.xlu1 %724 }
 0x2e1   : > { %v726_v29 = vsub.f32 %v718_v5, %v725_v28 }
 0x2e3   : > { %v727_v30 = vmul.f32 1.442695, %v726_v29 }
 0x2e5   : > { %1489 = vpow2.f32 %v727_v30 }
 0x2e8   : > { %v839_v31 = vpop.xlane.xlu0 %838 }
 0x2e9   : > { %v840_v32 = vsub.f32 %v832_v11, %v839_v31  ;;  %v1297_v11 = vld [vmem:[%s1980_s4 + $0x68] sm:$0xff] }
 0x2ea   : > { %v1032_v12 = vpack.c.bf16 %v1297_v11, %v1296_v10 }
 0x2eb   : > { %v841_v33 = vmul.f32 1.442695, %v840_v32 }
 0x2ec   : > { %1410 = vmatpush3.bf16.msra.mxu1 %v1032_v12 }
 0x2ed   : > { %1491 = vpow2.f32 %v841_v33  ;;  %1411 = vmatprep.subr.bf16.mxu1 %v1615_v3 }
 0x2ef   : > { %v1490_v34 = vpop.eup %1489 }
 0x2f0   : > { %v950_v35 = vpop.xlane.xlu0 %949  ;;  %v729_v36 = vsel %vm562_vm3, %v1490_v34, 0.0 }
 0x2f1   : > { %v951_v37 = vsub.f32 %v943_v17, %v950_v35  ;;  %730 = vadd.xlane.f32.xlu0 %v729_v36  ;;  %v1298_v17 = vld [vmem:[%s1980_s4 + $0x70] sm:$0xff] }
 0x2f2   : > { %v1033_v19 = vpack.c.bf16 %v1299_v18, %v1298_v17 }
 0x2f3   : > { %v952_v38 = vmul.f32 1.442695, %v951_v37 }
 0x2f4   : > { %1412 = vmatpush3.bf16.msra.mxu1 %v1033_v19 }
 0x2f5   : > { %1493 = vpow2.f32 %v952_v38 }
 0x2f7   : > { %v1492_v39 = vpop.eup %1491 }
 0x2f8   : > { %v843_v40 = vsel %vm562_vm3, %v1492_v39, 0.0 }
 0x2f9   : > { %844 = vadd.xlane.f32.xlu1 %v843_v40 }
 0x2ff   : > { %v1494_v41 = vpop.eup %1493 }
 0x300   : > { %v954_v42 = vsel %vm562_vm3, %v1494_v41, 0.0 }
 0x301   : > { %955 = vadd.xlane.f32.xlu0 %v954_v42 }
 0x309   : > { %v617_v43 = vpop.xlane.xlu1 %616 }
 0x30a   : > { %1495 = vrcp.f32 %v617_v43  ;;  %961 = vrot.lane.b32.xlu1 %v1290_v27, %s1619_s20  ;;  %s1620_s20 = smov 8  }
 0x30d   : > { %v740_v46 = vpop.permute.xlu1 %739 }
 0x30e   : > { %v745_v48 = vsel %vm625_vm4, %v740_v46, 0 }
 0x314   : > { %v1496_v44 = vpop.eup %1495 }
 0x315   : > { %v619_v45 = vmul.f32 %v1496_v44, %v1488_v25 }
 0x317   : > { %850 = vrot.lane.b32.xlu0 %v1290_v27, %s1617_s18  ;;  %v621_v47 = vpack.c.bf16 %v619_v45, %v619_v45 }
 0x319   : > { %1370 = vmatmul.mubr.msk.bf16.vlgmr.msra.gmra.mrb[8].mxu0 %vm562_vm3, %v621_v47 }
 0x31a   : > { %1380 = vmatpush3.bf16.msra.mxu0 %v745_v48  ;;  %1381 = vmatprep.mubr.msk.bf16.mxu0 %vm1616_vm0, %v1615_v3 }
 0x31b   : > { %1391 = vmatprep.subr.bf16.mxu0 %v1615_v3 }
 0x37e   : > { %v731_v49 = vpop.xlane.xlu0 %730 }
 0x37f   : > { %1497 = vrcp.f32 %v731_v49 }
 0x386   : > { %v845_v50 = vpop.xlane.xlu1 %844 }
 0x387   : > { %1499 = vrcp.f32 %v845_v50 }
 0x389   : > { %v1498_v51 = vpop.eup %1497 }
 0x38a   : > { %v733_v52 = vmul.f32 %v1498_v51, %v1490_v34  ;;  %v962_v59 = vpop.permute.xlu1 %961 }
 0x38b   : > { %v967_v61 = vsel %vm625_vm4, %v962_v59, 0 }
 0x38c   : > { %v735_v53 = vpack.c.bf16 %v733_v52, %v733_v52  ;;  %v734_v62 = vadd.f32 %v733_v52, %v619_v45 }
 0x38e   : > { %1382 = vmatmul.mubr.msk.bf16.vlgmr.msra.gmra.mrb[12].mxu0 %vm562_vm3, %v735_v53  ;;  %v956_v54 = vpop.xlane.xlu0 %955 }
 0x38f   : > { %1501 = vrcp.f32 %v956_v54  ;;  %1393 = vmatprep.mubr.msk.bf16.mxu0 %vm1616_vm0, %v1615_v3 }
 0x391   : > { %v1500_v55 = vpop.eup %1499 }
 0x392   : > { %v847_v56 = vmul.f32 %v1500_v55, %v1492_v39  ;;  %v851_v57 = vpop.permute.xlu0 %850 }
 0x393   : > { %v856_v58 = vsel %vm625_vm4, %v851_v57, 0 }
 0x394   : > { %1392 = vmatpush3.bf16.msra.mxu0 %v856_v58  ;;  %v849_v60 = vpack.c.bf16 %v847_v56, %v847_v56  ;;  %v848_v1 = vadd.f32 %v847_v56, %v734_v62 }
 0x395   : > { %1403 = vmatprep.subr.bf16.mxu0 %v1615_v3 }
 0x397   : > { %1394 = vmatmul.mubr.msk.bf16.vlgmr.msra.gmra.mrb[16].mxu0 %vm562_vm3, %v849_v60 }
 0x398   : > { %1404 = vmatpush3.bf16.msra.mxu0 %v967_v61  ;;  %1405 = vmatprep.mubr.msk.bf16.mxu0 %vm1616_vm0, %v1615_v3 }
 0x399   : > { %v1502_v63 = vpop.eup %1501 }
 0x39a   : > { %v958_v0 = vmul.f32 %v1502_v63, %v1494_v41 }
 0x39c   : > { %v960_v2 = vpack.c.bf16 %v958_v0, %v958_v0  ;;  %v959_v4 = vadd.f32 %v958_v0, %v848_v1 }
 0x39e   : > { %v1086_v5 = vmul.f32 0.25, %v959_v4 }
 0x39f   : > { %1406 = vmatmul.mubr.msk.bf16.vlgmr.msra.gmra.mrb[20].mxu0 %vm562_vm3, %v960_v2 }
 0x3a0   : > { %1087 = vst.msk [vmem:[%s1871_s16] sm:$0xff] %vm562_vm3, %v1086_v5 }
 0x3ec   : > { %v663_v6 = vpop.f32.mrb[8].mxu0 }
 0x3ed   : > { %v1371_v7 = vpop.f32.mrb[9].mxu0 }
 0x3ee   : > { %v666_v8 = vpop.f32.mrb[10].mxu0 }
 0x3ef   : > { %v1372_v9 = vpop.f32.mrb[11].mxu0 }
 0x461   : > { %v781_v13 = vpop.f32.mrb[12].mxu0 }
 0x462   : > { %1010 = vrot.lane.b32.xlu1 %v781_v13, %s1620_s20  ;;  %v1383_v14 = vpop.f32.mrb[13].mxu0  ;;  %s1896_s20 = scalar_lea.hbm %s1983_s7, %s1984_s17 }
 0x463   : > { %v784_v15 = vpop.f32.mrb[14].mxu0 }
 0x464   : > { %v1384_v16 = vpop.f32.mrb[15].mxu0 }
 0x46a   : > { %v892_v20 = vpop.f32.mrb[16].mxu0 }
 0x46b   : > { %1014 = vrot.lane.b32.xlu0 %v892_v20, %s1621_s12  ;;  %v1395_v21 = vpop.f32.mrb[17].mxu0  ;;  %s1507_s12 = sshll.u32 %s1623_s10, 4  ;;  %s1508_s12 = int_to_ptr.vmem [resolvable:$false] %s1507_s12 }
 0x46c   : > { %v895_v22 = vpop.f32.mrb[18].mxu0  ;;  %p1510_p1 = scmp.lt.s32.totalorder %s1123_s21, %s1508_s12 }
 0x46d   : > { %v1396_v23 = vpop.f32.mrb[19].mxu0 }
 0x472   : > { %v1003_v24 = vpop.f32.mrb[20].mxu0 }
 0x473   : > { %1018 = vrot.lane.b32.xlu1 %v1003_v24, %s1622_s30  ;;  %v1407_v3 = vpop.f32.mrb[21].mxu0  ;;  %s1509_s30 = scalar_lea.vmem %s1508_s12, 256 }
 0x474   : > { %v1006_v25 = vpop.f32.mrb[22].mxu0  ;;  %p1511_p2 = scmp.lt.s32.totalorder %s1509_s30, %s1503_s8 }
 0x475   : > { %v1408_v26 = vpop.f32.mrb[23].mxu0 }
 0x476   : > { %p1512_p3 = por %p1511_p2, %p1510_p1 }
 0x478   : > { %p1513_p5 = pnand %p1512_p3, %p1506_p0 }
 0x4d4   : > { %v1011_v27 = vpop.permute.xlu1 %1010 }
 0x4d5   : > { %v1021_v29 = vsel %vm562_vm3, %v663_v6, %v1011_v27 }
 0x4dd   : > { %v1015_v28 = vpop.permute.xlu0 %1014 }
 0x4de   : > { %v1023_v30 = vsel %vm1022_vm5, %v1021_v29, %v1015_v28 }
 0x4e5   : > { %v1019_v31 = vpop.permute.xlu1 %1018 }
 0x4e6   : > { %v1025_v32 = vsel %vm1024_vm6, %v1023_v30, %v1019_v31 }
 0x4e7   : > { %v1026_v33 = vpack.c.bf16 %v1025_v32, %v1025_v32 }
 0x4e9   : > { %1414 = vmatmul.mubr.msk.bf16.vlgmr.msra.gmra.mrb[20].mxu1 %vm384_vm1, %v1026_v33 }
 0x4ea   : > { %1516 = shalt.err (!%p1513_p5)
}
 0x4eb   : > { %s1517_s16 = scalar_lea.hbm %s1896_s20, 128  ;;  %s1521_s10 = scalar_lea.hbm %s1983_s7, 256 }
 0x4ec   : > { %p1518_p6 = scmp.ne.s32.totalorder %s1896_s20, %s1517_s16  ;;  %p1522_p10 = scmp.lt.u32.totalorder %s1896_s20, %s1983_s7 }
 0x4ed   : > { %p1523_p11 = scmp.lt.u32.totalorder %s1521_s10, %s1517_s16  ;;  %p1525_p13 = scmp.lt.u32.totalorder %s1517_s16, %s1896_s20 }
 0x4ee   : > { %p1519_p7 = pnand %p1518_p6, %p1705_p4 }
 0x4ef   : > { %p1524_p12 = por %p1523_p11, %p1522_p10 }
 0x4f0   : > { %p1520_p9 = pneg %p1519_p7 }
 0x4f1   : > { %p1526_p0 = por %p1525_p13, %p1524_p12 }
 0x4f3   : > { %p1527_p1 = pnand %p1526_p0, %p1520_p9 }
 0x4f5   : > { %1530 = shalt.err (!%p1527_p1)
}
 0x4f6   : > { %1418 = dma.vmem_to_hbm [thread:$0]  (%p1705_p4), %s1123_s21, 128, %s1896_s20, %s1094_s22   ;;  %v1301_v34 = vld [vmem:[%s1981_s5 + $0x3] ss:$0 sm:$0xff] }
 0x4f7   : > { %s334_s17 = scalar_lea.vmem [#allocation3], %s1264_s15  ;;  %s1987_s16 = sshll.u32 %s1605_s27, 7 }
 0x4f8   : > { %s1108_s18 = sshll.u32 %s334_s17, 4  ;;  %s1927_s12 = scalar_lea.hbm %s1982_s6, %s1987_s16  ;;  %s1929_s18 = int_to_ptr.vmem [resolvable:$true] %s1108_s18 }
 0x4f9   : > { %s1089_s15 = scalar_lea.sflag [#allocation4], %s1863_s23  ;;  %s1531_s20 = scalar_lea.vmem %s1929_s18, 128 }
 0x4fa   : > { %p1532_p2 = scmp.ne.s32.totalorder %s1929_s18, %s1531_s20  ;;  %s1624_s27 = smov [#allocation3]  }
 0x4fb   : > { %s1535_s21 = sshll.u32 %s1624_s27, 4  ;;  %s1536_s21 = int_to_ptr.vmem [resolvable:$false] %s1535_s21 }
 0x4fc   : > { %p1533_p3 = pnand %p1532_p2, %p1705_p4  ;;  %s1537_s22 = scalar_lea.vmem %s1536_s21, 256 }
 0x4fd   : > { %p1538_p6 = scmp.lt.s32.totalorder %s1929_s18, %s1536_s21  ;;  %p1539_p7 = scmp.lt.s32.totalorder %s1537_s22, %s1531_s20 }
 0x4fe   : > { %p1534_p5 = pneg %p1533_p3 }
 0x4ff   : > { %p1540_p9 = por %p1539_p7, %p1538_p6 }
 0x501   : > { %p1541_p10 = pnand %p1540_p9, %p1534_p5 }
 0x5bc   : > { %v1079_v35 = vpop.f32.mrb[20].mxu1 }
 0x5bd   : > { %v1080_v36 = vadd.f32 %v1301_v34, %v1079_v35  ;;  %v1415_v37 = vpop.f32.mrb[21].mxu1 }
 0x5be   : > { %v1082_v38 = vpop.f32.mrb[22].mxu1 }
 0x5bf   : > { %v1416_v39 = vpop.f32.mrb[23].mxu1  ;;  %1085 = vst.msk [vmem:[%s334_s17] sm:$0xff] %vm384_vm1, %v1080_v36 }
 0x5c0   : > { %1544 = shalt.err (!%p1541_p10)
}
 0x5c1   : > { %s1545_s23 = scalar_lea.hbm %s1927_s12, 128  ;;  %s1549_s17 = scalar_lea.hbm %s1982_s6, 256 }
 0x5c2   : > { %p1546_p11 = scmp.ne.s32.totalorder %s1927_s12, %s1545_s23  ;;  %p1550_p0 = scmp.lt.u32.totalorder %s1927_s12, %s1982_s6 }
 0x5c3   : > { %p1551_p1 = scmp.lt.u32.totalorder %s1549_s17, %s1545_s23  ;;  %p1553_p3 = scmp.lt.u32.totalorder %s1545_s23, %s1927_s12 }
 0x5c4   : > { %p1547_p12 = pnand %p1546_p11, %p1705_p4 }
 0x5c5   : > { %p1552_p2 = por %p1551_p1, %p1550_p0 }
 0x5c6   : > { %p1548_p13 = pneg %p1547_p12 }
 0x5c7   : > { %p1554_p5 = por %p1553_p3, %p1552_p2 }
 0x5c9   : > { %p1555_p6 = pnand %p1554_p5, %p1548_p13 }
 0x5cb   : > { %1558 = shalt.err (!%p1555_p6)
}
 0x5cc   : > { %1417 = dma.vmem_to_hbm [thread:$0]  (%p1705_p4), %s1929_s18, 128, %s1927_s12, %s1089_s15  }
 0x5cd PF: > { %p1428_p7 = scmp.ge.s32.totalorder %s1613_s29, 2  ;;  %s1134_s10 = sand.u32 1, %s1593_s24  }
 0x5ce   : > { %s1135_s20 = scalar_lea.sflag [#allocation4], %s1134_s10 }
 0x5cf   : > { %p1422_p9 = pnand %p1428_p7, %p1712_p8 }
 0x5d1   : > { %1584 = dma.done.wait (!%p1422_p9), %s1135_s20, 128  }
 0x5d2   : > { %1586 = vsyncadd (!%p1422_p9), %s1135_s20, 4294967168  ;;  %s1144_s27 = scalar_lea.sflag [#allocation6], %s1134_s10 }
 0x5d3   : > { %1588 = dma.done.wait (!%p1422_p9), %s1144_s27, 128  }
 0x5d4   : > { %1590 = vsyncadd (!%p1422_p9), %s1144_s27, 4294967168  ;;  %s24_s29 = sadd.s32 1, %s1613_s29   ;;  %s1988_s24 = smov %s1597_s25 }
 0x5d5   : > { %p21_p10 = scmp.ge.s32.totalorder %s24_s29, 4   ;;  %s1989_s25 = smov %s1601_s26 }
 0x5d6   : > { %s1990_s26 = smov %s1718_s14  ;;  %s1991_s27 = smov %s1609_s28 }
 0x5d7   : > { %s1992_s28 = smov %s1994_s9  ;;  %23 = sbr.rel (!%p21_p10) target bundleno = 6 (0x6), region = 117 }
 0x5de   :  { %1149 = vsyncpa [#allocation4], 1 }
 0x5df   :  { %1151 = vsyncpa [#allocation4 + $0x1], 1 }
 0x5e0   :  { %1152 = vsyncpa [#allocation6], 1 }
 0x5e1   :  { %1154 = vsyncpa [#allocation6 + $0x1], 1 }

</bundles_post_ra>
